<compile_context>
chip_gen: v7x
topology: tpu7x:2x2x1
jax: 0.10.0
libtpu: 0.0.40
codegen_flags: <defaults>
</compile_context>

<pallas_src>
from functools import partial

import jax
import jax.numpy as jnp
from jax.experimental import pallas as pl
from jax.experimental.pallas import tpu as pltpu


def _round_up(n, m):
    return ((n + m - 1) // m) * m


# ---------------------------------------------------------------------------
# Kernel body
# ---------------------------------------------------------------------------
def gru_cell_kernel(x_ref, h_ref, wx_ref, uzr_ref, u_ref, out_ref):
    # Shapes (per grid step):
    #   x_ref   : (bb, Ip)           matmul dtype (cast in wrapper)
    #   h_ref   : (bb, Hp)           f32 state (gate math stays f32)
    #   wx_ref  : (Ip, 3*Hp)         fused [Wz | Wr | W]   (resident)
    #   uzr_ref : (Hp, 2*Hp)         fused [Uz | Ur]       (resident)
    #   u_ref   : (Hp, Hp)           U                     (resident)
    #   out_ref : (bb, Hp)           f32 (aliased onto h)
    Hp = u_ref.shape[0]
    mm_dtype = wx_ref.dtype

    x = x_ref[...]                       # already mm_dtype
    h = h_ref[...]                       # f32
    h_mm = h.astype(mm_dtype)

    # One wide matmul for all three x-projections, one for both h-projections.
    xw = jnp.dot(x, wx_ref[...], preferred_element_type=jnp.float32)      # (bb, 3Hp)
    hu = jnp.dot(h_mm, uzr_ref[...], preferred_element_type=jnp.float32)  # (bb, 2Hp)

    # Fused z/r epilogue: one VPU add + one EUP region over (bb, 2Hp);
    # slices at multiples of 128 lanes are free.
    zr = jax.nn.sigmoid(xw[:, : 2 * Hp] + hu)
    zt = zr[:, :Hp]
    rt = zr[:, Hp:]

    # _h = tanh((h * rt) @ U + x @ W)
    hr = (h * rt).astype(mm_dtype)
    h_cand = jnp.tanh(
        jnp.dot(hr, u_ref[...], preferred_element_type=jnp.float32)
        + xw[:, 2 * Hp:]
    )

    # h_new = (1 - zt) * _h + zt * h  ==  h + (1 - zt) * (_h - h)
    out_ref[...] = (h + (1.0 - zt) * (h_cand - h)).astype(out_ref.dtype)


# ---------------------------------------------------------------------------
# Parameter preparation (call ONCE, outside the per-step path)
# ---------------------------------------------------------------------------
def fuse_gru_weights(Wz, Uz, Wr, Ur, W, U, *, compute_dtype=jnp.bfloat16):
    """Fuse + zero-pad the six GRU weights (exact: padded rows/cols are zero).

    Returns (Wx, Uzr, Up) with shapes (Ip, 3*Hp), (Hp, 2*Hp), (Hp, Hp) where
    Ip/Hp are input/hidden dims rounded up to 128.  Pass compute_dtype=None or
    jnp.float32 to keep f32 matmul operands.
    """
    I, H = Wz.shape
    Ip = _round_up(I, 128)
    Hp = _round_up(H, 128)

    def pad(m, rows, cols):
        return jnp.pad(m, ((0, rows - m.shape[0]), (0, cols - m.shape[1])))

    Wx = jnp.concatenate([pad(Wz, Ip, Hp), pad(Wr, Ip, Hp), pad(W, Ip, Hp)], axis=1)
    Uzr = jnp.concatenate([pad(Uz, Hp, Hp), pad(Ur, Hp, Hp)], axis=1)
    Up = pad(U, Hp, Hp)

    if compute_dtype is not None:
        Wx = Wx.astype(compute_dtype)
        Uzr = Uzr.astype(compute_dtype)
        Up = Up.astype(compute_dtype)
    return Wx, Uzr, Up


# ---------------------------------------------------------------------------
# Single-step wrapper (expects pre-fused weights)
# ---------------------------------------------------------------------------
@partial(jax.jit, static_argnames=("block_b",))
def gru_cell_fused(x, h, Wx, Uzr, Up, *, block_b=512):
    B, I = x.shape
    H = h.shape[1]
    Ip = Wx.shape[0]
    Hp = Up.shape[0]
    mm_dtype = Wx.dtype
    itemsize_w = jnp.dtype(mm_dtype).itemsize

    # Sublane packing: bf16 operands want 16-row tiles, f32 wants 8.
    sub = 16 if itemsize_w == 2 else 8

    # Batch tile: guarantee >= 2 tiles whenever B allows it so the "parallel"
    # grid axis actually feeds both of v7x's TensorCores (1-TC chips unaffected).
    B_aligned = _round_up(B, sub)
    if B > sub:
        bb = min(block_b, _round_up(pl.cdiv(B_aligned, 2), sub))
    else:
        bb = B_aligned
    Bp = _round_up(B, bb)

    # --- VMEM budgeting --------------------------------------------------
    w_bytes = (Ip * 3 * Hp + Hp * 2 * Hp + Hp * Hp) * itemsize_w
    # Single-buffer the resident weights once double-buffering them gets big
    # (constant index_map -> second buffer is pure waste; matters for v7x 64 MiB).
    single_buffer_weights = (2 * w_bytes) > (16 * 2 ** 20)
    w_bufs = 1 if single_buffer_weights else 2
    io_bytes = 2 * (bb * Ip * itemsize_w + 2 * bb * Hp * 4)   # x, h, out (dbl-buffered)
    scratch_bytes = bb * 8 * Hp * 4                           # xw/hu/zr/candidate slabs
    vmem_limit = int(min(
        max(2 * (w_bytes * w_bufs + io_bytes + scratch_bytes), 32 * 2 ** 20),
        112 * 2 ** 20,
    ))

    # --- pad activations (exact: padded rows/cols contribute zero) --------
    xp = jnp.pad(x, ((0, Bp - B), (0, Ip - I))).astype(mm_dtype)   # (Bp, Ip)
    hp = jnp.pad(h, ((0, Bp - B), (0, Hp - H)))                    # (Bp, Hp) f32 state

    w_kwargs = dict(pipeline_mode=pl.Buffered(1)) if single_buffer_weights else {}

    grid = (Bp // bb,)
    out = pl.pallas_call(
        gru_cell_kernel,
        out_shape=jax.ShapeDtypeStruct((Bp, Hp), hp.dtype),        # dtype tied to state
        grid=grid,
        in_specs=[
            pl.BlockSpec((bb, Ip), lambda i: (i, 0)),              # x tile
            pl.BlockSpec((bb, Hp), lambda i: (i, 0)),              # h tile
            pl.BlockSpec((Ip, 3 * Hp), lambda i: (0, 0), **w_kwargs),   # fused Wx
            pl.BlockSpec((Hp, 2 * Hp), lambda i: (0, 0), **w_kwargs),   # fused Uzr
            pl.BlockSpec((Hp, Hp), lambda i: (0, 0), **w_kwargs),       # U
        ],
        out_specs=pl.BlockSpec((bb, Hp), lambda i: (i, 0)),
        input_output_aliases={1: 0},                               # new state over h
        compiler_params=pltpu.CompilerParams(
            dimension_semantics=("parallel",),                     # batch across TCs
            vmem_limit_bytes=vmem_limit,
        ),
    )(xp, hp, Wx, Uzr, Up)

    # NOTE: padded batch rows hold garbage (sliced away here); do not persist
    # the padded aliased buffer across steps without re-padding h.
    return out[:B, :H]


def gru_cell(x, h, Wz, Uz, Wr, Ur, W, U, *, compute_dtype=jnp.bfloat16, block_b=512):
    """Convenience one-shot wrapper (fuses weights per call — prefer
    fuse_gru_weights + gru_cell_fused when stepping repeatedly)."""
    Wx, Uzr, Up = fuse_gru_weights(Wz, Uz, Wr, Ur, W, U, compute_dtype=compute_dtype)
    return gru_cell_fused(x, h, Wx, Uzr, Up, block_b=block_b)


def gru_cell_ref(x, h, Wz, Uz, Wr, Ur, W, U):
    zt = jax.nn.sigmoid(x @ Wz + h @ Uz)
    rt = jax.nn.sigmoid(x @ Wr + h @ Ur)
    h_cand = jnp.tanh((h * rt) @ U + x @ W)
    return (1.0 - zt) * h_cand + zt * h


if __name__ == "__main__":
    batch = 8
    input_size = 16
    hidden_size = 32

    key = jax.random.PRNGKey(0)
    kx, kh, k0, k1, k2, k3, k4, k5 = jax.random.split(key, 8)

    x = jax.random.normal(kx, (batch, input_size), dtype=jnp.float32)
    h = jax.random.normal(kh, (batch, hidden_size), dtype=jnp.float32)

    # Deterministic parameter init matching torch.randn shapes in __init__.
    Wz = jax.random.normal(k0, (input_size, hidden_size), dtype=jnp.float32)
    Uz = jax.random.normal(k1, (hidden_size, hidden_size), dtype=jnp.float32)
    Wr = jax.random.normal(k2, (input_size, hidden_size), dtype=jnp.float32)
    Ur = jax.random.normal(k3, (hidden_size, hidden_size), dtype=jnp.float32)
    W = jax.random.normal(k4, (input_size, hidden_size), dtype=jnp.float32)
    U = jax.random.normal(k5, (hidden_size, hidden_size), dtype=jnp.float32)

    ref = gru_cell_ref(x, h, Wz, Uz, Wr, Ur, W, U)

    # f32 matmul operands: tight-tolerance correctness check.
    fused_f32 = fuse_gru_weights(Wz, Uz, Wr, Ur, W, U, compute_dtype=jnp.float32)
    out_f32 = jax.block_until_ready(gru_cell_fused(x, h, *fused_f32))
    assert out_f32.shape == (batch, hidden_size)
    assert jnp.allclose(out_f32, ref, atol=1e-5, rtol=1e-5), "f32 mismatch vs reference"

    # bf16 weights (default production path, MXU-native on v5e/v6e/v7x):
    # gate math stays f32, so only operand rounding error — loose tolerance.
    fused_bf16 = fuse_gru_weights(Wz, Uz, Wr, Ur, W, U)   # compute_dtype=bf16 default
    out_bf16 = jax.block_until_ready(gru_cell_fused(x, h, *fused_bf16))
    assert out_bf16.shape == (batch, hidden_size)
    assert jnp.allclose(out_bf16, ref, atol=2e-1, rtol=2e-1), "bf16 mismatch vs reference"

    print("KERNEL_OK")
</pallas_src>

<mosaic_0001>
module attributes {stable_mosaic.version = 11 : i64} {
  func.func @gru_cell_kernel(%arg0: i32, %arg1: memref<8x128xf32, #tpu.memory_space<vmem>>, %arg2: memref<8x128xf32, #tpu.memory_space<vmem>>, %arg3: memref<128x384xf32, #tpu.memory_space<vmem>>, %arg4: memref<128x256xf32, #tpu.memory_space<vmem>>, %arg5: memref<128x128xf32, #tpu.memory_space<vmem>>, %arg6: memref<8x128xf32, #tpu.memory_space<vmem>>) attributes {dimension_semantics = [#tpu.dimension_semantics<parallel>], iteration_bounds = array<i64: 1>, scalar_prefetch = 0 : i64, scratch_operands = 0 : i64, tpu.core_type = #tpu.core_type<tc>, window_params = [{transform_indices = @transform_0, window_bounds = array<i64: 8, 128>}, {transform_indices = @transform_1, window_bounds = array<i64: 8, 128>}, {pipeline_mode = #tpu.pipeline_mode<synchronous>, transform_indices = @transform_2, window_bounds = array<i64: 128, 384>}, {pipeline_mode = #tpu.pipeline_mode<synchronous>, transform_indices = @transform_3, window_bounds = array<i64: 128, 256>}, {pipeline_mode = #tpu.pipeline_mode<synchronous>, transform_indices = @transform_4, window_bounds = array<i64: 128, 128>}, {transform_indices = @transform_5, window_bounds = array<i64: 8, 128>}]} {
    %c0 = arith.constant 0 : index
    %c0_0 = arith.constant 0 : index
    %0 = vector.load %arg1[%c0, %c0_0] : memref<8x128xf32, #tpu.memory_space<vmem>>, vector<8x128xf32>
    %c0_1 = arith.constant 0 : index
    %c0_2 = arith.constant 0 : index
    %1 = vector.load %arg2[%c0_1, %c0_2] : memref<8x128xf32, #tpu.memory_space<vmem>>, vector<8x128xf32>
    %c0_3 = arith.constant 0 : index
    %c0_4 = arith.constant 0 : index
    %2 = vector.load %arg3[%c0_3, %c0_4] : memref<128x384xf32, #tpu.memory_space<vmem>>, vector<128x384xf32>
    %cst = arith.constant dense<0.000000e+00> : vector<8x384xf32>
    %3 = tpu.matmul %0, %2, %cst {dimension_numbers = #tpu.dot_dimension_numbers<[1], [0], [0], [1], [0, 0, 1, 1], [], []>} : vector<8x128xf32>, vector<128x384xf32>, vector<8x384xf32> -> vector<8x384xf32>
    %c0_5 = arith.constant 0 : index
    %c0_6 = arith.constant 0 : index
    %4 = vector.load %arg4[%c0_5, %c0_6] : memref<128x256xf32, #tpu.memory_space<vmem>>, vector<128x256xf32>
    %cst_7 = arith.constant dense<0.000000e+00> : vector<8x256xf32>
    %5 = tpu.matmul %1, %4, %cst_7 {dimension_numbers = #tpu.dot_dimension_numbers<[1], [0], [0], [1], [0, 0, 1, 1], [], []>} : vector<8x128xf32>, vector<128x256xf32>, vector<8x256xf32> -> vector<8x256xf32>
    %6 = vector.extract_strided_slice %3 {offsets = [0, 0], sizes = [8, 256], strides = [1, 1]} : vector<8x384xf32> to vector<8x256xf32>
    %7 = arith.addf %6, %5 : vector<8x256xf32>
    %8 = arith.negf %7 : vector<8x256xf32>
    %9 = math.exp %8 : vector<8x256xf32>
    %cst_8 = arith.constant 1.000000e+00 : f32
    %10 = vector.broadcast %cst_8 : f32 to vector<8x256xf32>
    %11 = arith.addf %10, %9 : vector<8x256xf32>
    %12 = arith.divf %10, %11 : vector<8x256xf32>
    %13 = vector.extract_strided_slice %12 {offsets = [0, 0], sizes = [8, 128], strides = [1, 1]} : vector<8x256xf32> to vector<8x128xf32>
    %14 = vector.extract_strided_slice %12 {offsets = [0, 128], sizes = [8, 128], strides = [1, 1]} : vector<8x256xf32> to vector<8x128xf32>
    %15 = arith.mulf %1, %14 : vector<8x128xf32>
    %c0_9 = arith.constant 0 : index
    %c0_10 = arith.constant 0 : index
    %16 = vector.load %arg5[%c0_9, %c0_10] : memref<128x128xf32, #tpu.memory_space<vmem>>, vector<128x128xf32>
    %cst_11 = arith.constant dense<0.000000e+00> : vector<8x128xf32>
    %17 = tpu.matmul %15, %16, %cst_11 {dimension_numbers = #tpu.dot_dimension_numbers<[1], [0], [0], [1], [0, 0, 1, 1], [], []>} : vector<8x128xf32>, vector<128x128xf32>, vector<8x128xf32> -> vector<8x128xf32>
    %18 = vector.extract_strided_slice %3 {offsets = [0, 256], sizes = [8, 128], strides = [1, 1]} : vector<8x384xf32> to vector<8x128xf32>
    %19 = arith.addf %17, %18 : vector<8x128xf32>
    %20 = math.tanh %19 : vector<8x128xf32>
    %cst_12 = arith.constant 1.000000e+00 : f32
    %21 = vector.broadcast %cst_12 : f32 to vector<8x128xf32>
    %22 = arith.subf %21, %13 : vector<8x128xf32>
    %23 = arith.subf %20, %1 : vector<8x128xf32>
    %24 = arith.mulf %22, %23 : vector<8x128xf32>
    %25 = arith.addf %1, %24 : vector<8x128xf32>
    %c0_13 = arith.constant 0 : index
    %c0_14 = arith.constant 0 : index
    %26 = vector.load %arg6[%c0_13, %c0_14] : memref<8x128xf32, #tpu.memory_space<vmem>>, vector<8x128xf32>
    tpu.vector_store %arg6[%c0_13, %c0_14], %25 {strides = array<i32>} : memref<8x128xf32, #tpu.memory_space<vmem>>, vector<8x128xf32>,
    return
  }
  func.func @transform_0(%arg0: i32) -> (i32, i32) {
    %c0_i32 = arith.constant 0 : i32
    %c0_i32_0 = arith.constant 0 : i32
    return %arg0, %c0_i32 : i32, i32
  }
  func.func @transform_1(%arg0: i32) -> (i32, i32) {
    %c0_i32 = arith.constant 0 : i32
    %c0_i32_0 = arith.constant 0 : i32
    return %arg0, %c0_i32 : i32, i32
  }
  func.func @transform_2(%arg0: i32) -> (i32, i32) {
    %c0_i32 = arith.constant 0 : i32
    %c0_i32_0 = arith.constant 0 : i32
    %c0_i32_1 = arith.constant 0 : i32
    return %c0_i32, %c0_i32_0 : i32, i32
  }
  func.func @transform_3(%arg0: i32) -> (i32, i32) {
    %c0_i32 = arith.constant 0 : i32
    %c0_i32_0 = arith.constant 0 : i32
    %c0_i32_1 = arith.constant 0 : i32
    return %c0_i32, %c0_i32_0 : i32, i32
  }
  func.func @transform_4(%arg0: i32) -> (i32, i32) {
    %c0_i32 = arith.constant 0 : i32
    %c0_i32_0 = arith.constant 0 : i32
    %c0_i32_1 = arith.constant 0 : i32
    return %c0_i32, %c0_i32_0 : i32, i32
  }
  func.func @transform_5(%arg0: i32) -> (i32, i32) {
    %c0_i32 = arith.constant 0 : i32
    %c0_i32_0 = arith.constant 0 : i32
    return %arg0, %c0_i32 : i32, i32
  }
}

</mosaic_0001>

<bundles_post_ra>
// kernel: gru_cell_fused.1
= control target key start
LH: loop header
LB: loop body
LE: loop exit
PB: predicated region body
PF: predicated region fallthrough
CT: control target
= control target key end

     0   :  { %10 = vsyncpa [#allocation3], 0  ;;  %s895_s0 = inlined_call_operand.vmem [shape: f32[8,128], index: 0, kind: input, shape index: {}]   ;;  %s896_s1 = inlined_call_operand.vmem [shape: f32[8,128], index: 1, kind: input, shape index: {}, may-alias: {1,5}]   ;;  %s897_s2 = inlined_call_operand.hbm [shape: f32[128,384], index: 2, kind: input, shape index: {}]   ;;  %s898_s3 = inlined_call_operand.hbm [shape: f32[128,256], index: 3, kind: input, shape index: {}]   ;;  %s899_s4 = inlined_call_operand.hbm [shape: f32[128,128], index: 4, kind: input, shape index: {}]   ;;  %s900_s5 = inlined_call_operand.vmem [shape: f32[8,128], index: 5, kind: output, shape index: {}, may-alias: {1,5}]  }
   0x1   :  { %11 = vsyncpa [#allocation5], 0  ;;  %s782_s18 = smov [#allocation4]   ;;  %s712_s22 = scalar_lea.hbm %s898_s3, 4096 }
   0x2   :  { %s33_s19 = sshll.u32 %s782_s18, 4  ;;  %p713_p0 = scmp.ne.s32.totalorder %s898_s3, %s712_s22  ;;  %s34_s19 = int_to_ptr.vmem [resolvable:$true] %s33_s19 }
   0x3   :  { %p716_p1 = scmp.lt.u32.totalorder %s712_s22, %s898_s3 }
   0x5   :  { %p718_p2 = pnand %p716_p1, %p713_p0 }
   0x7   :  { %721 = shalt.err (!%p718_p2)
}
   0x8   :  { %s722_s27 = scalar_lea.vmem %s34_s19, 4096  ;;  %p727_p4 = scmp.lt.s32.totalorder %s34_s19, %s34_s19 }
   0x9   :  { %p723_p3 = scmp.ne.s32.totalorder %s34_s19, %s722_s27  ;;  %p728_p5 = scmp.lt.s32.totalorder %s722_s27, %s722_s27 }
   0xb   :  { %p729_p6 = por %p728_p5, %p727_p4 }
   0xd   :  { %p730_p7 = pnand %p729_p6, %p723_p3 }
   0xf   :  { %733 = shalt.err (!%p730_p7)
}
  0x10   :  { %s783_s28 = smov 256   ;;  %s784_s29 = smov 16  }
  0x11   :  { %39 = dma.hbm_to_vmem [thread:$0]  %s898_s3, 4096, %s34_s19, [#allocation5], %s783_s28, %s783_s28, %s784_s29  }
  0x12   :  { %s785_s7 = smov [#allocation2]   ;;  %s734_s11 = scalar_lea.hbm %s897_s2, 6144 }
  0x13   :  { %s21_s8 = sshll.u32 %s785_s7, 4  ;;  %p735_p8 = scmp.ne.s32.totalorder %s897_s2, %s734_s11  ;;  %s22_s8 = int_to_ptr.vmem [resolvable:$true] %s21_s8 }
  0x14   :  { %p738_p9 = scmp.lt.u32.totalorder %s734_s11, %s897_s2 }
  0x16   :  { %p740_p10 = pnand %p738_p9, %p735_p8 }
  0x18   :  { %743 = shalt.err (!%p740_p10)
}
  0x19   :  { %s744_s16 = scalar_lea.vmem %s22_s8, 6144  ;;  %p749_p12 = scmp.lt.s32.totalorder %s22_s8, %s22_s8 }
  0x1a   :  { %p745_p11 = scmp.ne.s32.totalorder %s22_s8, %s744_s16  ;;  %p750_p13 = scmp.lt.s32.totalorder %s744_s16, %s744_s16 }
  0x1c   :  { %p751_p0 = por %p750_p13, %p749_p12 }
  0x1e   :  { %p752_p1 = pnand %p751_p0, %p745_p11 }
  0x20   :  { %755 = shalt.err (!%p752_p1)
}
  0x21   :  { %s786_s3 = smov 384   ;;  %s787_s17 = smov 24  }
  0x22   :  { %27 = dma.hbm_to_vmem [thread:$0]  %s897_s2, 6144, %s22_s8, [#allocation3], %s786_s3, %s786_s3, %s787_s17  }
  0x23   :  { %s788_s20 = smov [#allocation6]   ;;  %s756_s24 = scalar_lea.hbm %s899_s4, 2048 }
  0x24   :  { %s45_s21 = sshll.u32 %s788_s20, 4  ;;  %p757_p2 = scmp.ne.s32.totalorder %s899_s4, %s756_s24  ;;  %s46_s21 = int_to_ptr.vmem [resolvable:$true] %s45_s21 }
  0x25   :  { %p760_p3 = scmp.lt.u32.totalorder %s756_s24, %s899_s4 }
  0x27   :  { %p762_p4 = pnand %p760_p3, %p757_p2 }
  0x29   :  { %765 = shalt.err (!%p762_p4)
}
  0x2a   :  { %s766_s29 = scalar_lea.vmem %s46_s21, 2048  ;;  %p771_p6 = scmp.lt.s32.totalorder %s46_s21, %s46_s21 }
  0x2b   :  { %p767_p5 = scmp.ne.s32.totalorder %s46_s21, %s766_s29  ;;  %p772_p7 = scmp.lt.s32.totalorder %s766_s29, %s766_s29 }
  0x2d   :  { %p773_p8 = por %p772_p7, %p771_p6 }
  0x2f   :  { %p774_p9 = pnand %p773_p8, %p767_p5 }
  0x31   :  { %777 = shalt.err (!%p774_p9)
}
  0x32   :  { %s789_s2 = smov 128   ;;  %s790_s30 = smov 8  }
  0x33   :  { %51 = dma.hbm_to_vmem [thread:$0]  %s899_s4, 2048, %s46_s21, [#allocation5], %s789_s2, %s789_s2, %s790_s30  }
  0x34   :  { %778 = dma.done.wait [#allocation3], 6144  }
  0x35   :  { %779 = vsyncadd [#allocation3], 4294961152 }
  0x36   :  { %780 = dma.done.wait [#allocation5], 6144  }
  0x37   :  { %781 = vsyncadd [#allocation5], 4294961152  ;;  %v791_v0 = vmov 0.0   ;;  %v792_v1 = vmov 0.0|0.0   ;;  %vm793_vm0 = vmmov 0   ;;  %v64_v2 = vld [vmem:[#allocation2 + $0x8] sm:$0xff] }
  0x38   :  { %175 = vmatprep.mubr.f32.mxu0 %v791_v0  ;;  %606 = vmatprep.subr.bf16.mxu1 %v792_v1  ;;  %v67_v3 = vld [vmem:[#allocation2 + $0x20] sm:$0xff]  ;;  %v66_v6 = vld [vmem:[#allocation2 + $0x18] sm:$0xff]  ;;  %v73_v8 = vld [vmem:[#allocation2 + $0x50] sm:$0xff] }
  0x39   :  { %536 = vmatprep.mubr.msk.f32.mxu1 %vm793_vm0, %v791_v0  ;;  %v63_v4 = vld [vmem:[#allocation2] sm:$0xff]  ;;  %v574_v5 = vpack.c.bf16 %v67_v3, %v64_v2  ;;  %v70_v7 = vld [vmem:[#allocation2 + $0x38] sm:$0xff]  ;;  %v69_v11 = vld [vmem:[#allocation2 + $0x30] sm:$0xff] }
  0x3a   :  { %v576_v9 = vpack.c.bf16 %v66_v6, %v63_v4  ;;  %v578_v10 = vpack.c.bf16 %v73_v8, %v70_v7  ;;  %v72_v12 = vld [vmem:[#allocation2 + $0x48] sm:$0xff]  ;;  %v79_v14 = vld [vmem:[#allocation2 + $0x80] sm:$0xff]  ;;  %v78_v18 = vld [vmem:[#allocation2 + $0x78] sm:$0xff] }
  0x3b   :  { %v76_v13 = vld [vmem:[#allocation2 + $0x68] sm:$0xff]  ;;  %575 = vmatprep.subr.bf16.mxu0 %v574_v5  ;;  %v580_v15 = vpack.c.bf16 %v72_v12, %v69_v11  ;;  %v75_v17 = vld [vmem:[#allocation2 + $0x60] sm:$0xff]  ;;  %v82_v19 = vld [vmem:[#allocation2 + $0x98] sm:$0xff] }
  0x3c   :  { %577 = vmatpush1.bf16.msra.mxu0 %v576_v9  ;;  %v582_v16 = vpack.c.bf16 %v79_v14, %v76_v13  ;;  %v85_v20 = vld [vmem:[#allocation2 + $0xb0] sm:$0xff]  ;;  %v584_v21 = vpack.c.bf16 %v78_v18, %v75_v17  ;;  %v84_v24 = vld [vmem:[#allocation2 + $0xa8] sm:$0xff]  ;;  %v91_v26 = vld [vmem:[#allocation2 + $0xe0] sm:$0xff] }
  0x3d   :  { %579 = vmatprep.subr.bf16.mxu0 %v578_v10  ;;  %v586_v22 = vpack.c.bf16 %v85_v20, %v82_v19  ;;  %v81_v23 = vld [vmem:[#allocation2 + $0x90] sm:$0xff]  ;;  %v88_v25 = vld [vmem:[#allocation2 + $0xc8] sm:$0xff]  ;;  %v87_v29 = vld [vmem:[#allocation2 + $0xc0] sm:$0xff] }
  0x3e   :  { %v588_v27 = vpack.c.bf16 %v84_v24, %v81_v23  ;;  %v590_v28 = vpack.c.bf16 %v91_v26, %v88_v25  ;;  %v90_v30 = vld [vmem:[#allocation2 + $0xd8] sm:$0xff]  ;;  %v97_v32 = vld [vmem:[#allocation2 + $0x110] sm:$0xff]  ;;  %v96_v36 = vld [vmem:[#allocation2 + $0x108] sm:$0xff] }
  0x3f   :  { %v94_v31 = vld [vmem:[#allocation2 + $0xf8] sm:$0xff]  ;;  %v592_v33 = vpack.c.bf16 %v90_v30, %v87_v29  ;;  %v93_v35 = vld [vmem:[#allocation2 + $0xf0] sm:$0xff]  ;;  %v100_v37 = vld [vmem:[#allocation2 + $0x128] sm:$0xff] }
  0x40   :  { %581 = vmatpush1.bf16.msra.mxu0 %v580_v15  ;;  %v594_v34 = vpack.c.bf16 %v97_v32, %v94_v31  ;;  %v103_v38 = vld [vmem:[#allocation2 + $0x140] sm:$0xff]  ;;  %v596_v39 = vpack.c.bf16 %v96_v36, %v93_v35  ;;  %v102_v42 = vld [vmem:[#allocation2 + $0x138] sm:$0xff]  ;;  %v109_v44 = vld [vmem:[#allocation2 + $0x170] sm:$0xff] }
  0x41   :  { %583 = vmatprep.subr.bf16.mxu0 %v582_v16  ;;  %v99_v40 = vld [vmem:[#allocation2 + $0x120] sm:$0xff]  ;;  %v598_v41 = vpack.c.bf16 %v103_v38, %v100_v37  ;;  %v106_v43 = vld [vmem:[#allocation2 + $0x158] sm:$0xff]  ;;  %v65_v45 = vld [vmem:[#allocation2 + $0x10] sm:$0xff] }
  0x42   :  { %v68_v46 = vld [vmem:[#allocation2 + $0x28] sm:$0xff]  ;;  %v71_v47 = vld [vmem:[#allocation2 + $0x40] sm:$0xff]  ;;  %v74_v49 = vld [vmem:[#allocation2 + $0x58] sm:$0xff]  ;;  %v600_v50 = vpack.c.bf16 %v102_v42, %v99_v40  ;;  %v602_v51 = vpack.c.bf16 %v109_v44, %v106_v43 }
  0x43   :  { %v607_v48 = vpack.c.bf16 %v68_v46, %v65_v45  ;;  %v105_v52 = vld [vmem:[#allocation2 + $0x150] sm:$0xff]  ;;  %v108_v53 = vld [vmem:[#allocation2 + $0x168] sm:$0xff]  ;;  %v610_v55 = vpack.c.bf16 %v74_v49, %v71_v47  ;;  %v255_v56 = vld [vmem:[#allocation4 + $0x18] sm:$0xff] }
  0x44   :  { %585 = vmatpush1.bf16.msra.mxu0 %v584_v21  ;;  %v253_v54 = vld [vmem:[#allocation4 + $0x8] sm:$0xff]  ;;  %v77_v57 = vld [vmem:[#allocation2 + $0x70] sm:$0xff]  ;;  %v604_v59 = vpack.c.bf16 %v108_v53, %v105_v52  ;;  %v252_v61 = vld [vmem:[#allocation4] sm:$0xff] }
  0x45   :  { %587 = vmatprep.subr.bf16.mxu0 %v586_v22  ;;  %608 = vmatpush3.bf16.msra.mxu1 %v607_v48  ;;  %v80_v58 = vld [vmem:[#allocation2 + $0x88] sm:$0xff]  ;;  %v630_v60 = vpack.c.bf16 %v255_v56, %v253_v54  ;;  %v254_v62 = vld [vmem:[#allocation4 + $0x10] sm:$0xff]  ;;  %v259_v3 = vld [vmem:[#allocation4 + $0x38] sm:$0xff] }
  0x46   :  { %609 = vmatprep.subr.bf16.mxu1 %v792_v1  ;;  %v257_v63 = vld [vmem:[#allocation4 + $0x28] sm:$0xff]  ;;  %v613_v2 = vpack.c.bf16 %v80_v58, %v77_v57  ;;  %v83_v4 = vld [vmem:[#allocation2 + $0xa0] sm:$0xff]  ;;  %v86_v5 = vld [vmem:[#allocation2 + $0xb8] sm:$0xff]  ;;  %v632_v7 = vpack.c.bf16 %v254_v62, %v252_v61 }
  0x47   :  { %v869_v6 = vld [vmem:[%s895_s0] sm:$0xff]  ;;  %v634_v8 = vpack.c.bf16 %v259_v3, %v257_v63  ;;  %v256_v9 = vld [vmem:[#allocation4 + $0x20] sm:$0xff]  ;;  %v261_v11 = vld [vmem:[#allocation4 + $0x48] sm:$0xff]  ;;  %v616_v12 = vpack.c.bf16 %v86_v5, %v83_v4 }
  0x48   :  { %589 = vmatpush1.bf16.msra.mxu0 %v588_v27  ;;  %v258_v10 = vld [vmem:[#allocation4 + $0x30] sm:$0xff]  ;;  %v263_v13 = vld [vmem:[#allocation4 + $0x58] sm:$0xff]  ;;  %v92_v15 = vld [vmem:[#allocation2 + $0xe8] sm:$0xff] }
  0x49   :  { %591 = vmatprep.subr.bf16.mxu0 %v590_v28  ;;  %611 = vmatpush3.bf16.msra.mxu1 %v610_v55  ;;  %v89_v14 = vld [vmem:[#allocation2 + $0xd0] sm:$0xff]  ;;  %v636_v16 = vpack.c.bf16 %v258_v10, %v256_v9  ;;  %v638_v17 = vpack.c.bf16 %v263_v13, %v261_v11  ;;  %v260_v18 = vld [vmem:[#allocation4 + $0x40] sm:$0xff]  ;;  %v265_v20 = vld [vmem:[#allocation4 + $0x68] sm:$0xff] }
  0x4a   :  { %612 = vmatprep.subr.bf16.mxu1 %v792_v1  ;;  %v262_v19 = vld [vmem:[#allocation4 + $0x50] sm:$0xff]  ;;  %v619_v21 = vpack.c.bf16 %v92_v15, %v89_v14  ;;  %v267_v22 = vld [vmem:[#allocation4 + $0x78] sm:$0xff]  ;;  %v95_v23 = vld [vmem:[#allocation2 + $0x100] sm:$0xff] }
  0x4b   :  { %v98_v24 = vld [vmem:[#allocation2 + $0x118] sm:$0xff]  ;;  %v640_v25 = vpack.c.bf16 %v262_v19, %v260_v18  ;;  %v642_v26 = vpack.c.bf16 %v267_v22, %v265_v20  ;;  %v264_v27 = vld [vmem:[#allocation4 + $0x60] sm:$0xff]  ;;  %v266_v28 = vld [vmem:[#allocation4 + $0x70] sm:$0xff] }
  0x4c   :  { %593 = vmatpush1.bf16.msra.mxu0 %v592_v33  ;;  %v269_v29 = vld [vmem:[#allocation4 + $0x88] sm:$0xff]  ;;  %v622_v30 = vpack.c.bf16 %v98_v24, %v95_v23  ;;  %v271_v31 = vld [vmem:[#allocation4 + $0x98] sm:$0xff]  ;;  %v101_v32 = vld [vmem:[#allocation2 + $0x130] sm:$0xff] }
  0x4d   :  { %595 = vmatprep.subr.bf16.mxu0 %v594_v34  ;;  %614 = vmatpush3.bf16.msra.mxu1 %v613_v2  ;;  %v104_v33 = vld [vmem:[#allocation2 + $0x148] sm:$0xff]  ;;  %v644_v34 = vpack.c.bf16 %v266_v28, %v264_v27  ;;  %v646_v35 = vpack.c.bf16 %v271_v31, %v269_v29  ;;  %v268_v36 = vld [vmem:[#allocation4 + $0x80] sm:$0xff]  ;;  %v270_v37 = vld [vmem:[#allocation4 + $0x90] sm:$0xff] }
  0x4e   :  { %615 = vmatprep.subr.bf16.mxu1 %v792_v1  ;;  %v273_v38 = vld [vmem:[#allocation4 + $0xa8] sm:$0xff]  ;;  %v275_v40 = vld [vmem:[#allocation4 + $0xb8] sm:$0xff]  ;;  %v648_v43 = vpack.c.bf16 %v270_v37, %v268_v36  ;;  %v272_v45 = vld [vmem:[#allocation4 + $0xa0] sm:$0xff] }
  0x4f   :  { %v110_v42 = vld [vmem:[#allocation2 + $0x178] sm:$0xff]  ;;  %v650_v44 = vpack.c.bf16 %v275_v40, %v273_v38  ;;  %v274_v46 = vld [vmem:[#allocation4 + $0xb0] sm:$0xff]  ;;  %v277_v47 = vld [vmem:[#allocation4 + $0xc8] sm:$0xff] }
  0x50   :  { %597 = vmatpush1.bf16.msra.mxu0 %v596_v39  ;;  %v625_v39 = vpack.c.bf16 %v104_v33, %v101_v32  ;;  %v279_v49 = vld [vmem:[#allocation4 + $0xd8] sm:$0xff]  ;;  %v652_v52 = vpack.c.bf16 %v274_v46, %v272_v45  ;;  %v276_v54 = vld [vmem:[#allocation4 + $0xc0] sm:$0xff]  ;;  %v278_v55 = vld [vmem:[#allocation4 + $0xd0] sm:$0xff] }
  0x51   :  { %599 = vmatprep.subr.bf16.mxu0 %v598_v41  ;;  %617 = vmatpush3.bf16.msra.mxu1 %v616_v12  ;;  %v107_v41 = vld [vmem:[#allocation2 + $0x160] sm:$0xff]  ;;  %v654_v53 = vpack.c.bf16 %v279_v49, %v277_v47  ;;  %v281_v57 = vld [vmem:[#allocation4 + $0xe8] sm:$0xff]  ;;  %v283_v58 = vld [vmem:[#allocation4 + $0xf8] sm:$0xff] }
  0x52   :  { %618 = vmatprep.subr.bf16.mxu1 %v792_v1  ;;  %v628_v48 = vpack.c.bf16 %v110_v42, %v107_v41  ;;  %v280_v61 = vld [vmem:[#allocation4 + $0xe0] sm:$0xff]  ;;  %v282_v62 = vld [vmem:[#allocation4 + $0xf0] sm:$0xff]  ;;  %v373_v4 = vld [vmem:[#allocation6 + $0x18] sm:$0xff] }
  0x53   :  { %v660_v63 = vpack.c.bf16 %v282_v62, %v280_v61  ;;  %v62_v2 = vld [vmem:[%s896_s1] sm:$0xff]  ;;  %v377_v9 = vld [vmem:[#allocation6 + $0x38] sm:$0xff]  ;;  %v378_v11 = vld [vmem:[#allocation6 + $0x40] sm:$0xff] }
  0x54   :  { %601 = vmatpush1.bf16.msra.mxu0 %v600_v50  ;;  %v370_v50 = vld [vmem:[#allocation6] sm:$0xff]  ;;  %v372_v3 = vld [vmem:[#allocation6 + $0x10] sm:$0xff]  ;;  %v379_v12 = vld [vmem:[#allocation6 + $0x48] sm:$0xff] }
  0x55   :  { %603 = vmatprep.subr.bf16.mxu0 %v602_v51  ;;  %620 = vmatpush3.bf16.msra.mxu1 %v619_v21  ;;  %v371_v51 = vld [vmem:[#allocation6 + $0x8] sm:$0xff]  ;;  %v666_v5 = vpack.c.bf16 %v373_v4, %v372_v3  ;;  %v675_v13 = vpack.c.bf16 %v379_v12, %v378_v11  ;;  %v380_v14 = vld [vmem:[#allocation6 + $0x50] sm:$0xff]  ;;  %v381_v15 = vld [vmem:[#allocation6 + $0x58] sm:$0xff] }
  0x56   :  { %621 = vmatprep.subr.bf16.mxu1 %v792_v1  ;;  %v663_v56 = vpack.c.bf16 %v371_v51, %v370_v50  ;;  %v383_v18 = vld [vmem:[#allocation6 + $0x68] sm:$0xff]  ;;  %v384_v20 = vld [vmem:[#allocation6 + $0x70] sm:$0xff]  ;;  %v385_v21 = vld [vmem:[#allocation6 + $0x78] sm:$0xff] }
  0x57   :  { %v684_v22 = vpack.c.bf16 %v385_v21, %v384_v20 }
  0x58   :  { %605 = vmatpush1.bf16.msra.mxu0 %v604_v59  ;;  %v656_v59 = vpack.c.bf16 %v278_v55, %v276_v54 }
  0x59   :  { %631 = vmatprep.subr.bf16.mxu0 %v630_v60  ;;  %623 = vmatpush3.bf16.msra.mxu1 %v622_v30  ;;  %v658_v60 = vpack.c.bf16 %v283_v58, %v281_v57 }
  0x5a   :  { %624 = vmatprep.subr.bf16.mxu1 %v792_v1 }
  0x5b   :  { %176 = vmatmul.mubr.f32.vlgmr.msra.gmra.mrb[0].mxu0 %v869_v6 }
  0x5c   :  { %633 = vmatpush1.bf16.msra.mxu0 %v632_v7  ;;  %348 = vmatprep.mubr.f32.mxu0 %v791_v0  ;;  %v375_v7 = vld [vmem:[#allocation6 + $0x28] sm:$0xff] }
  0x5d   :  { %635 = vmatprep.subr.bf16.mxu0 %v634_v8  ;;  %626 = vmatpush3.bf16.msra.mxu1 %v625_v39 }
  0x5e   :  { %627 = vmatprep.subr.bf16.mxu1 %v792_v1 }
  0x60   :  { %637 = vmatpush1.bf16.msra.mxu0 %v636_v16  ;;  %v678_v16 = vpack.c.bf16 %v381_v15, %v380_v14 }
  0x61   :  { %639 = vmatprep.subr.bf16.mxu0 %v638_v17  ;;  %629 = vmatpush3.bf16.msra.mxu1 %v628_v48  ;;  %v382_v17 = vld [vmem:[#allocation6 + $0x60] sm:$0xff] }
  0x62   :  { %662 = vmatprep.subr.bf16.mxu1 %v792_v1  ;;  %v681_v19 = vpack.c.bf16 %v383_v18, %v382_v17 }
  0x64   :  { %641 = vmatpush1.bf16.msra.mxu0 %v640_v25  ;;  %537 = vmatmul.mubr.f32.vlgmr.msra.gmra.mrb[0].mxu1 %v869_v6  ;;  %v374_v6 = vld [vmem:[#allocation6 + $0x20] sm:$0xff] }
  0x65   :  { %643 = vmatprep.subr.bf16.mxu0 %v642_v26  ;;  %664 = vmatpush3.bf16.msra.mxu1 %v663_v56  ;;  %v669_v8 = vpack.c.bf16 %v375_v7, %v374_v6 }
  0x66   :  { %665 = vmatprep.subr.bf16.mxu1 %v792_v1  ;;  %571 = vmatprep.mubr.msk.f32.mxu1 %vm793_vm0, %v791_v0  ;;  %v376_v0 = vld [vmem:[#allocation6 + $0x30] sm:$0xff] }
  0x67   :  { %v672_v10 = vpack.c.bf16 %v377_v9, %v376_v0 }
  0x68   :  { %645 = vmatpush1.bf16.msra.mxu0 %v644_v34 }
  0x69   :  { %647 = vmatprep.subr.bf16.mxu0 %v646_v35  ;;  %667 = vmatpush3.bf16.msra.mxu1 %v666_v5 }
  0x6a   :  { %668 = vmatprep.subr.bf16.mxu1 %v792_v1 }
  0x6c   :  { %649 = vmatpush1.bf16.msra.mxu0 %v648_v43 }
  0x6d   :  { %651 = vmatprep.subr.bf16.mxu0 %v650_v44  ;;  %670 = vmatpush3.bf16.msra.mxu1 %v669_v8 }
  0x6e   :  { %671 = vmatprep.subr.bf16.mxu1 %v792_v1 }
  0x70   :  { %653 = vmatpush1.bf16.msra.mxu0 %v652_v52 }
  0x71   :  { %655 = vmatprep.subr.bf16.mxu0 %v654_v53  ;;  %673 = vmatpush3.bf16.msra.mxu1 %v672_v10 }
  0x72   :  { %674 = vmatprep.subr.bf16.mxu1 %v792_v1 }
  0x74   :  { %657 = vmatpush1.bf16.msra.mxu0 %v656_v59 }
  0x75   :  { %659 = vmatprep.subr.bf16.mxu0 %v658_v60  ;;  %676 = vmatpush3.bf16.msra.mxu1 %v675_v13 }
  0x76   :  { %677 = vmatprep.subr.bf16.mxu1 %v792_v1 }
  0x78   :  { %661 = vmatpush1.bf16.msra.mxu0 %v660_v63 }
  0x79   :  { %679 = vmatpush3.bf16.msra.mxu1 %v678_v16 }
  0x7a   :  { %680 = vmatprep.subr.bf16.mxu1 %v792_v1 }
  0x7b   :  { %349 = vmatmul.mubr.f32.vlgmr.msra.gmra.mrb[0].mxu0 %v62_v2 }
  0x7d   :  { %682 = vmatpush3.bf16.msra.mxu1 %v681_v19 }
  0x7e   :  { %683 = vmatprep.subr.bf16.mxu1 %v792_v1 }
  0x81   :  { %685 = vmatpush3.bf16.msra.mxu1 %v684_v22 }
 0x14e   :  { %v350_v23 = vpop.f32.mrb[0].mxu0 }
 0x14f   :  { %v352_v24 = vpop.f32.mrb[1].mxu0  ;;  %v468_v30 = vmul.f32 -1.442695, %v350_v23 }
 0x150   :  { %v469_v25 = vmul.f32 -1.442695, %v352_v24 }
 0x152   :  { %702 = vpow2.f32 %v469_v25 }
 0x15c   :  { %v703_v26 = vpop.eup %702 }
 0x15d   :  { %v364_v27 = vadd.f32 1.0, %v703_v26 }
 0x15f   :  { %704 = vrcp.f32 %v364_v27 }
 0x160   :  { %706 = vpow2.f32 %v468_v30 }
 0x169   :  { %v705_v28 = vpop.eup %704 }
 0x16a   :  { %v369_v29 = vmul.f32 %v705_v28, %v62_v2  ;;  %v707_v31 = vpop.eup %706 }
 0x16b   :  { %v363_v32 = vadd.f32 1.0, %v707_v31 }
 0x16c   :  { %572 = vmatmul.mubr.f32.vlgmr.msra.gmra.mrb[0].mxu1 %v369_v29 }
 0x16d   :  { %708 = vrcp.f32 %v363_v32 }
 0x177   :  { %v709_v34 = vpop.eup %708 }
 0x178   :  { %v457_v36 = vsub.f32 1.0, %v709_v34 }
 0x23f   :  { %v452_v1 = vpop.f32.mrb[0].mxu1 }
 0x240   :  { %710 = vtanh.f32 %v452_v1  ;;  %v573_v33 = vpop.f32.mrb[1].mxu1 }
 0x24a   :  { %v711_v35 = vpop.eup %710 }
 0x24b   :  { %v458_v37 = vsub.f32 %v711_v35, %v62_v2 }
 0x24d   :  { %v459_v38 = vmul.f32 %v458_v37, %v457_v36 }
 0x24f   :  { %v460_v39 = vadd.f32 %v459_v38, %v62_v2 }
 0x251   :  { %461 = vst [vmem:[%s900_s5] sm:$0xff] %v460_v39 }
 0x252   :  { %466 = vsyncpa [#allocation3], 1 }
 0x253   :  { %467 = vsyncpa [#allocation5], 1 }

</bundles_post_ra>
